<compile_context>
chip_gen: v6e
topology: v6e:2x2x1
jax: 0.10.0
libtpu: 0.0.40
codegen_flags: <defaults>
</compile_context>

<pallas_src>
import jax
import jax.numpy as jnp
from jax.experimental import pallas as pl
from jax.experimental.pallas import tpu as pltpu


def _period_adapt_kernel(data_ref, w_ref, b_ref, mean_ref, var_ref):
    # data_ref : (Bb, T, C)  VMEM   one batch-block of the input (any float dtype)
    # w_ref    : (1, C)      VMEM   fc1 weight row (shared across grid steps)
    # b_ref    : (1,)        SMEM   fc1 bias scalar (f32)
    # mean_ref : (Bb, T)     VMEM   dense sigmoid output (Bb on sublanes, T on lanes)
    # var_ref  : (Bb, 1)     VMEM   per-batch RMS output
    Bb, T, C = data_ref.shape

    # Upcast to f32 inside the kernel (exact accumulation; v5e has no bf16 VPU/EUP).
    d = data_ref[...].astype(jnp.float32)                  # (Bb, T, C)
    w = w_ref[...].astype(jnp.float32).reshape(1, 1, C)    # broadcasts over (Bb, T)
    bias = b_ref[0]                                        # scalar read from SMEM

    # fc1: x[b, t] = sum_c d[b, t, c] * w[c] + bias.
    # C is small, so a VPU multiply + XLU lane reduce beats spinning up the MXU.
    # The reduce over the last (lane) axis directly yields the lane-dense (Bb, T) layout.
    x = jnp.sum(d * w, axis=-1) + bias                     # (Bb, T), f32

    # sigmoid(x) = 1 / (1 + exp(-x)) via EUP exp + EUP approximate reciprocal,
    # refined with two Newton steps to full f32 accuracy (avoids a VALU divide).
    y = 1.0 + jnp.exp(-x)
    r = pl.reciprocal(y, approx=True)
    r = r * (2.0 - y * r)
    r = r * (2.0 - y * r)
    mean = r                                               # (Bb, T)
    mean_ref[...] = mean.astype(mean_ref.dtype)

    # "variance" (really an RMS): sqrt( mean_over_T( (x - sigmoid(x))^2 ) ) per batch row.
    diff = x - mean                                        # (Bb, T)
    mse = jnp.sum(diff * diff, axis=-1, keepdims=True) * (1.0 / T)   # (Bb, 1)
    var_ref[...] = jnp.sqrt(mse).astype(var_ref.dtype)


def _round_up(x, m):
    return ((x + m - 1) // m) * m


def _padded_block_bytes(shape, dtype):
    """VMEM footprint of one block, accounting for (sublane, 128) tile padding on the
    last two dims.  Sublane granule: 8 for 4-byte, 16 for 2-byte, 32 for 1-byte dtypes."""
    itemsize = jnp.dtype(dtype).itemsize
    sub = {4: 8, 2: 16, 1: 32}.get(itemsize, 8)
    if len(shape) == 1:
        return _round_up(shape[0], 128) * itemsize
    lead = 1
    for dim in shape[:-2]:
        lead *= dim
    rows = _round_up(shape[-2], sub)
    cols = _round_up(shape[-1], 128)
    return lead * rows * cols * itemsize


def _vmem_budget():
    """(total resident budget, vmem_limit_bytes), derived from physical VMEM.

    v7x (64 MiB per TC)  -> ~32 MiB resident budget, 48 MiB scoped limit.
    v5e/v6e (128 MiB)    -> ~48 MiB resident budget, 64 MiB scoped limit.
    """
    cap = 64 * 1024 * 1024  # conservative default (v7x per-TC) if query fails
    try:
        info = pltpu.get_tpu_info()
        cap = int(getattr(info, "vmem_capacity_bytes", cap))
    except Exception:
        pass
    total_budget = min(cap // 2, 48 * 1024 * 1024)
    vmem_limit = min(cap - 8 * 1024 * 1024, total_budget + 16 * 1024 * 1024)
    return total_budget, vmem_limit


def _pick_batch_block(B, T, C, data_dtype, total_budget_bytes):
    """Largest legal Bb whose full double-buffered, tile-padded footprint fits the budget.

    Legal Bb: divides B, and is either a multiple of 8 (dense sublanes in the (Bb, T)
    output block) or equals B (block dim == full array dim).  When possible, prefer a
    Bb that gives >= 2 grid steps so the 'parallel' batch axis can shard across the two
    TensorCores on v7x.
    """
    def footprint(bb):
        data_b = 2 * _padded_block_bytes((bb, T, C), data_dtype)   # double-buffered
        mean_b = 2 * _padded_block_bytes((bb, T), data_dtype)
        var_b = 2 * _padded_block_bytes((bb, 1), data_dtype)
        w_b = 2 * _padded_block_bytes((1, C), data_dtype)
        return data_b + mean_b + var_b + w_b

    candidates = [d for d in range(1, B + 1) if B % d == 0 and (d % 8 == 0 or d == B)]
    candidates.sort(reverse=True)
    fitting = [d for d in candidates if footprint(d) <= total_budget_bytes]
    if not fitting:
        fitting = [min(candidates)]   # tiny-VMEM fallback; smallest legal block
    bb = fitting[0]
    # Prefer >= 2 grid steps (v7x megacore sharding) if a dense-sublane block allows it.
    multi = [d for d in fitting if d < B and d % 8 == 0]
    if bb == B and multi:
        bb = multi[0]
    return bb


def period_adaptation_output(data, weight, bias, *, batch_block=None):
    """data: (B, T, C), weight: (1, C) or (C,), bias: scalar-like -> (mean (B,T,1), var (B,1,1))."""
    B, T, C = data.shape
    weight = jnp.asarray(weight).reshape(1, C)
    bias_s = jnp.asarray(bias, dtype=jnp.float32).reshape(1)   # 1-D SMEM scalar

    total_budget, vmem_limit = _vmem_budget()
    if batch_block is None:
        batch_block = _pick_batch_block(B, T, C, data.dtype, total_budget)
    Bb = batch_block
    if B % Bb:
        raise ValueError(f"batch_block={Bb} must divide batch size {B}")
    grid = (B // Bb,)

    grid_spec = pltpu.PrefetchScalarGridSpec(
        num_scalar_prefetch=0,
        grid=grid,
        in_specs=[
            pl.BlockSpec((Bb, T, C), lambda i: (i, 0, 0)),              # data batch-block
            pl.BlockSpec((1, C), lambda i: (0, 0)),                     # weight (shared)
            pl.BlockSpec(memory_space=pltpu.MemorySpace.SMEM),          # bias scalar -> SMEM
        ],
        out_specs=[
            pl.BlockSpec((Bb, T), lambda i: (i, 0)),                    # dense (B, T) mean
            pl.BlockSpec((Bb, 1), lambda i: (i, 0)),                    # (B, 1) RMS
        ],
    )

    mean2d, var2d = pl.pallas_call(
        _period_adapt_kernel,
        out_shape=(
            jax.ShapeDtypeStruct((B, T), data.dtype),   # reshaped to (B, T, 1) below (free)
            jax.ShapeDtypeStruct((B, 1), data.dtype),   # reshaped to (B, 1, 1) below (free)
        ),
        grid_spec=grid_spec,
        compiler_params=pltpu.CompilerParams(
            dimension_semantics=("parallel",),   # batch-block axis shards across TCs on v7x
            vmem_limit_bytes=vmem_limit,
        ),
    )(data, weight, bias_s)

    # (B, T) -> (B, T, 1) and (B, 1) -> (B, 1, 1): identical flat element order, free in XLA.
    return mean2d.reshape(B, T, 1), var2d.reshape(B, 1, 1)


def reference(data, weight, bias):
    w = jnp.asarray(weight).reshape(-1)
    b = jnp.asarray(bias).reshape(())
    x = jnp.einsum("btc,c->bt", data.astype(jnp.float32), w.astype(jnp.float32))[..., None]
    x = x + b.astype(jnp.float32)
    mean = jax.nn.sigmoid(x)
    mse = jnp.mean((x - mean) ** 2, axis=1, keepdims=True)
    return mean.astype(data.dtype), jnp.sqrt(mse).astype(data.dtype)


if __name__ == "__main__":
    B, T, C = 2, 8, 32  # batch, sequence, compress_size

    key = jax.random.PRNGKey(0)
    k_data, k_w, k_b = jax.random.split(key, 3)

    data = jax.random.normal(k_data, (B, T, C), dtype=jnp.float32)

    # Deterministic init mimicking nn.Linear(compress_size, 1):
    # uniform(-1/sqrt(C), 1/sqrt(C)) for weight and bias.
    bound = 1.0 / (C ** 0.5)
    weight = jax.random.uniform(k_w, (1, C), jnp.float32, -bound, bound)
    bias = jax.random.uniform(k_b, (1,), jnp.float32, -bound, bound)

    mean, variance = period_adaptation_output(data, weight, bias)
    jax.block_until_ready((mean, variance))

    ref_mean, ref_var = reference(data, weight, bias)
    assert mean.shape == (B, T, 1) and variance.shape == (B, 1, 1)
    assert jnp.allclose(mean, ref_mean, atol=1e-5, rtol=1e-5)
    assert jnp.allclose(variance, ref_var, atol=1e-5, rtol=1e-5)

    print("KERNEL_OK")
</pallas_src>

<mosaic_0001>
module attributes {stable_mosaic.version = 11 : i64} {
  func.func @_period_adapt_kernel(%arg0: i32, %arg1: memref<2x8x32xf32, #tpu.memory_space<vmem>>, %arg2: memref<1x32xf32, #tpu.memory_space<vmem>>, %arg3: memref<1xf32, #tpu.memory_space<smem>>, %arg4: memref<2x8xf32, #tpu.memory_space<vmem>>, %arg5: memref<2x1xf32, #tpu.memory_space<vmem>>) attributes {dimension_semantics = [#tpu.dimension_semantics<parallel>], iteration_bounds = array<i64: 1>, scalar_prefetch = 0 : i64, scratch_operands = 0 : i64, tpu.core_type = #tpu.core_type<tc>, window_params = [{transform_indices = @transform_0, window_bounds = array<i64: 2, 8, 32>}, {pipeline_mode = #tpu.pipeline_mode<synchronous>, transform_indices = @transform_1, window_bounds = array<i64: 1, 32>}, {transform_indices = @transform_2, window_bounds = array<i64: 1>}, {transform_indices = @transform_3, window_bounds = array<i64: 2, 8>}, {transform_indices = @transform_4, window_bounds = array<i64: 2, 1>}]} {
    %c0 = arith.constant 0 : index
    %c0_0 = arith.constant 0 : index
    %c0_1 = arith.constant 0 : index
    %0 = vector.load %arg1[%c0, %c0_0, %c0_1] : memref<2x8x32xf32, #tpu.memory_space<vmem>>, vector<2x8x32xf32>
    %c0_2 = arith.constant 0 : index
    %c0_3 = arith.constant 0 : index
    %1 = vector.load %arg2[%c0_2, %c0_3] : memref<1x32xf32, #tpu.memory_space<vmem>>, vector<1x32xf32>
    %2 = vector.shape_cast %1 : vector<1x32xf32> to vector<1x1x32xf32>
    %c0_4 = arith.constant 0 : index
    %3 = memref.load %arg3[%c0_4] : memref<1xf32, #tpu.memory_space<smem>>
    %4 = vector.broadcast %2 : vector<1x1x32xf32> to vector<2x8x32xf32>
    %5 = arith.mulf %0, %4 : vector<2x8x32xf32>
    %cst = arith.constant dense<0.000000e+00> : vector<2x8xf32>
    %6 = vector.multi_reduction <add>, %5, %cst [2] : vector<2x8x32xf32> to vector<2x8xf32>
    %7 = vector.broadcast %3 : f32 to vector<2x8xf32>
    %8 = arith.addf %6, %7 : vector<2x8xf32>
    %cst_5 = arith.constant 0.000000e+00 : f32
    %9 = vector.broadcast %cst_5 : f32 to vector<2x8xf32>
    %10 = arith.subf %9, %8 : vector<2x8xf32>
    %11 = math.exp %10 : vector<2x8xf32>
    %cst_6 = arith.constant 1.000000e+00 : f32
    %12 = vector.broadcast %cst_6 : f32 to vector<2x8xf32>
    %13 = arith.addf %12, %11 : vector<2x8xf32>
    %14 = tpu.reciprocal %13 {approx = true} : vector<2x8xf32> -> vector<2x8xf32>
    %15 = arith.mulf %13, %14 : vector<2x8xf32>
    %cst_7 = arith.constant 2.000000e+00 : f32
    %16 = vector.broadcast %cst_7 : f32 to vector<2x8xf32>
    %17 = arith.subf %16, %15 : vector<2x8xf32>
    %18 = arith.mulf %14, %17 : vector<2x8xf32>
    %19 = arith.mulf %13, %18 : vector<2x8xf32>
    %cst_8 = arith.constant 2.000000e+00 : f32
    %20 = vector.broadcast %cst_8 : f32 to vector<2x8xf32>
    %21 = arith.subf %20, %19 : vector<2x8xf32>
    %22 = arith.mulf %18, %21 : vector<2x8xf32>
    %c0_9 = arith.constant 0 : index
    %c0_10 = arith.constant 0 : index
    %23 = vector.load %arg4[%c0_9, %c0_10] : memref<2x8xf32, #tpu.memory_space<vmem>>, vector<2x8xf32>
    tpu.vector_store %arg4[%c0_9, %c0_10], %22 {strides = array<i32>} : memref<2x8xf32, #tpu.memory_space<vmem>>, vector<2x8xf32>,
    %24 = arith.subf %8, %22 : vector<2x8xf32>
    %25 = arith.mulf %24, %24 : vector<2x8xf32>
    %cst_11 = arith.constant dense<0.000000e+00> : vector<2xf32>
    %26 = vector.multi_reduction <add>, %25, %cst_11 [1] : vector<2x8xf32> to vector<2xf32>
    %27 = vector.shape_cast %26 : vector<2xf32> to vector<2x1xf32>
    %cst_12 = arith.constant 1.250000e-01 : f32
    %28 = vector.broadcast %cst_12 : f32 to vector<2x1xf32>
    %29 = arith.mulf %27, %28 : vector<2x1xf32>
    %30 = math.sqrt %29 : vector<2x1xf32>
    %c0_13 = arith.constant 0 : index
    %c0_14 = arith.constant 0 : index
    %31 = vector.load %arg5[%c0_13, %c0_14] : memref<2x1xf32, #tpu.memory_space<vmem>>, vector<2x1xf32>
    tpu.vector_store %arg5[%c0_13, %c0_14], %30 {strides = array<i32>} : memref<2x1xf32, #tpu.memory_space<vmem>>, vector<2x1xf32>,
    return
  }
  func.func @transform_0(%arg0: i32) -> (i32, i32, i32) {
    %c0_i32 = arith.constant 0 : i32
    %c0_i32_0 = arith.constant 0 : i32
    %c0_i32_1 = arith.constant 0 : i32
    return %arg0, %c0_i32, %c0_i32_0 : i32, i32, i32
  }
  func.func @transform_1(%arg0: i32) -> (i32, i32) {
    %c0_i32 = arith.constant 0 : i32
    %c0_i32_0 = arith.constant 0 : i32
    %c0_i32_1 = arith.constant 0 : i32
    return %c0_i32, %c0_i32_0 : i32, i32
  }
  func.func @transform_2(%arg0: i32) -> i32 {
    %c0_i32 = arith.constant 0 : i32
    %c0_i32_0 = arith.constant 0 : i32
    return %c0_i32 : i32
  }
  func.func @transform_3(%arg0: i32) -> (i32, i32) {
    %c0_i32 = arith.constant 0 : i32
    %c0_i32_0 = arith.constant 0 : i32
    return %arg0, %c0_i32 : i32, i32
  }
  func.func @transform_4(%arg0: i32) -> (i32, i32) {
    %c0_i32 = arith.constant 0 : i32
    %c0_i32_0 = arith.constant 0 : i32
    return %arg0, %c0_i32 : i32, i32
  }
}

</mosaic_0001>

<bundles_post_ra>
// kernel: tpu_custom_call.1
= control target key start
LH: loop header
LB: loop body
LE: loop exit
PB: predicated region body
PF: predicated region fallthrough
CT: control target
= control target key end

     0   :  { %11 = vsyncpa [#allocation4], 0  ;;  %s244_s0 = inlined_call_operand.hbm [shape: f32[2,8,32], index: 0, kind: input, shape index: {}]   ;;  %s245_s1 = inlined_call_operand.vmem [shape: f32[1,32], index: 1, kind: input, shape index: {}]   ;;  %s246_s2 = inlined_call_operand.<no memory space> [shape: f32[1], index: 2, kind: input, shape index: {}]   ;;  %s247_s3 = inlined_call_operand.hbm [shape: f32[2,8], index: 3, kind: output, shape index: {0}]   ;;  %s248_s4 = inlined_call_operand.vmem [shape: f32[2,1], index: 4, kind: output, shape index: {1}]  }
   0x1   :  { %12 = vsyncpa [#allocation5], 0  ;;  %s200_s15 = smov [#allocation3]  }
   0x2   :  { %s18_s16 = sshll.u32 %s200_s15, 4  ;;  %s19_s16 = int_to_ptr.vmem [resolvable:$true] %s18_s16 }
   0x3   :  { %s164_s17 = scalar_lea.vmem %s19_s16, 256  ;;  %p169_p1 = scmp.lt.s32.totalorder %s19_s16, %s19_s16 }
   0x4   :  { %p165_p0 = scmp.ne.s32.totalorder %s19_s16, %s164_s17  ;;  %p170_p2 = scmp.lt.s32.totalorder %s164_s17, %s164_s17 }
   0x6   :  { %p171_p3 = por %p170_p2, %p169_p1 }
   0x8   :  { %p172_p4 = pnand %p171_p3, %p165_p0 }
   0xa   :  { %175 = shalt.err (!%p172_p4)
}
   0xb   :  { %s201_s18 = smov 128   ;;  %s202_s19 = smov 8  }
   0xc   :  { %24 = dma.hbm_to_vmem [thread:$0]  %s244_s0, 256, %s19_s16, [#allocation4], %s201_s18, %s201_s18, %s202_s19  }
   0xd   :  { %196 = dma.done.wait [#allocation4], 256  }
   0xe   :  { %197 = vsyncadd [#allocation4], 4294967040  ;;  %v32_v0 = vld [vmem:[#allocation3] sm:$0xff]  ;;  %vm44_vm0 = vcmask 261120   ;;  %v33_v2 = vld [vmem:[#allocation3 + $0x8] sm:$0xff]  ;;  %v51_v7 = vstv %s246_s2  ;;  %v78_v24 = vlaneseq  ;;  %vm88_vm1 = vcmask 1041409  }
   0xf   :  { %v141_v1 = vld [vmem:[%s245_s1] ss:$0 sm:$0xff]  ;;  %vm91_vm2 = vcmask 58368   ;;  %s203_s0 = smov [#allocation6]  }
  0x10   :  { %v42_v3 = vmul.f32 %v141_v1, %v32_v0  ;;  %v43_v4 = vmul.f32 %v141_v1, %v33_v2  ;;  %v79_v29 = vand.u32 127, %v78_v24  ;;  %v81_v30 = vshrl.u32 %v78_v24, 7  ;;  %s128_s1 = sshll.u32 %s203_s0, 4  ;;  %s129_s1 = int_to_ptr.vmem [resolvable:$true] %s128_s1 }
  0x11   :  { %s176_s2 = scalar_lea.vmem %s129_s1, 32  ;;  %p181_p6 = scmp.lt.s32.totalorder %s129_s1, %s129_s1 }
  0x12   :  { %v45_v5 = vsel %vm44_vm0, %v42_v3, 0.0  ;;  %v48_v6 = vsel %vm44_vm0, %v43_v4, 0.0  ;;  %v82_v35 = vsub.s32 %v79_v29, %v81_v30  ;;  %p177_p5 = scmp.ne.s32.totalorder %s129_s1, %s176_s2  ;;  %p182_p7 = scmp.lt.s32.totalorder %s176_s2, %s176_s2 }
  0x13   :  { %46 = vadd.xlane.f32.xlu0 %v45_v5 }
  0x14   :  { %p183_p8 = por %p182_p7, %p181_p6 }
  0x16   :  { %p184_p9 = pnand %p183_p8, %p177_p5 }
  0x17   :  { %49 = vadd.xlane.f32.xlu0 %v48_v6 }
  0x9c   :  { %v47_v8 = vpop.xlane.xlu0 %46 }
  0x9d   :  { %v52_v9 = vadd.f32 %v51_v7, %v47_v8 }
  0x9f   :  { %v54_v10 = vsub.f32 0.0, %v52_v9 }
  0xa0   :  { %v50_v11 = vpop.xlane.xlu0 %49 }
  0xa1   :  { %v56_v12 = vmul.f32 1.442695, %v54_v10  ;;  %v53_v13 = vadd.f32 %v51_v7, %v50_v11 }
  0xa3   :  { %146 = vpow2.f32 %v56_v12  ;;  %v55_v14 = vsub.f32 0.0, %v53_v13 }
  0xa5   :  { %v58_v15 = vmul.f32 1.442695, %v55_v14 }
  0xa7   :  { %148 = vpow2.f32 %v58_v15 }
  0xb0   :  { %v147_v16 = vpop.eup %146 }
  0xb1   :  { %v60_v17 = vadd.f32 1.0, %v147_v16 }
  0xb3   :  { %150 = vrcp.f32 %v60_v17 }
  0xb4   :  { %v149_v18 = vpop.eup %148 }
  0xb5   :  { %v61_v19 = vadd.f32 1.0, %v149_v18 }
  0xb7   :  { %152 = vrcp.f32 %v61_v19 }
  0xc0   :  { %v151_v20 = vpop.eup %150 }
  0xc1   :  { %v64_v21 = vmul.f32 %v151_v20, %v60_v17 }
  0xc3   :  { %v66_v22 = vsub.f32 2.0, %v64_v21 }
  0xc4   :  { %v153_v23 = vpop.eup %152 }
  0xc5   :  { %v68_v25 = vmul.f32 %v151_v20, %v66_v22  ;;  %v65_v26 = vmul.f32 %v153_v23, %v61_v19 }
  0xc7   :  { %v70_v27 = vmul.f32 %v68_v25, %v60_v17  ;;  %v67_v28 = vsub.f32 2.0, %v65_v26 }
  0xc9   :  { %v72_v31 = vsub.f32 2.0, %v70_v27  ;;  %v69_v32 = vmul.f32 %v153_v23, %v67_v28 }
  0xcb   :  { %v74_v33 = vmul.f32 %v72_v31, %v68_v25  ;;  %v71_v34 = vmul.f32 %v69_v32, %v61_v19 }
  0xcd   :  { %v93_v36 = vsub.f32 %v52_v9, %v74_v33  ;;  %v73_v37 = vsub.f32 2.0, %v71_v34  ;;  %v83_v39 = vrot.slane %v74_v33, %v82_v35 }
  0xcf   :  { %v75_v38 = vmul.f32 %v73_v37, %v69_v32  ;;  %v95_v40 = vmul.f32 %v93_v36, %v93_v36 }
  0xd1   :  { %v87_v41 = vrot.slane %v75_v38, %v82_v35  ;;  %v94_v42 = vsub.f32 %v53_v13, %v75_v38  ;;  %v102_v45 = vrot.slane %v95_v40, %v82_v35 }
  0xd3   :  { %v96_v43 = vmul.f32 %v94_v42, %v94_v42  ;;  %v89_v44 = vsel %vm88_vm1, %v87_v41, %v83_v39 }
  0xd4   :  { %92 = vst.msk [vmem:[#allocation6] sm:$0x3] %vm91_vm2, %v89_v44 }
  0xd5   :  { %v106_v46 = vrot.slane %v96_v43, %v82_v35 }
  0xd7   :  { %v107_v47 = vsel %vm88_vm1, %v106_v46, %v102_v45 }
  0xd8   :  { %v109_v48 = vsel %vm91_vm2, %v107_v47, 0.0 }
  0xd9   :  { %110 = vadd.xlane.f32.xlu1 %v109_v48 }
  0xda   :  { %187 = shalt.err (!%p184_p9)
}
  0xdb   :  { %131 = dma.vmem_to_hbm [thread:$0]  %s129_s1, 32, %s247_s3, [#allocation5]   ;;  %vm120_vm3 = vcmask 1024  }
 0x162   :  { %v111_v49 = vpop.xlane.xlu1 %110 }
 0x163   :  { %v112_v50 = vmul.f32 0.125, %v111_v49 }
 0x165   :  { %154 = vrsqrt.f32 %v112_v50  ;;  %vm115_vm4 = vcmp.eq.f32.partialorder %v112_v50, inf  ;;  %v118_v53 = vand.u32 2147483648, %v112_v50  ;;  %vm117_vm5 = vcmp.eq.f32.partialorder %v112_v50, 0.0 }
 0x172   :  { %v155_v51 = vpop.eup %154 }
 0x173   :  { %v114_v52 = vmul.f32 %v155_v51, %v112_v50 }
 0x175   :  { %v116_v54 = vsel %vm115_vm4, %v112_v50, %v114_v52 }
 0x176   :  { %v119_v55 = vsel %vm117_vm5, %v118_v53, %v116_v54 }
 0x177   :  { %121 = vst.msk [vmem:[%s248_s4] sm:$0x3] %vm120_vm3, %v119_v55 }
 0x178   :  { %198 = dma.done.wait [#allocation5], 32  }
 0x179   :  { %199 = vsyncadd [#allocation5], 4294967264 }
 0x17a   :  { %139 = vsyncpa [#allocation4], 1 }
 0x17b   :  { %140 = vsyncpa [#allocation5], 1 }

</bundles_post_ra>
